<compile_context>
chip_gen: v6e
topology: v6e:2x2x1
jax: 0.10.0
libtpu: 0.0.40
codegen_flags: <defaults>
</compile_context>

<pallas_src>
import jax
import jax.numpy as jnp
from jax.experimental import pallas as pl
from jax.experimental.pallas import tpu as pltpu


_NEG_LARGE = -1e30                 # exp(_NEG_LARGE) underflows to exactly 0.0
_VMEM_LIMIT = 48 * 1024 * 1024     # v7x-safe (64 MiB physical), > v5e default


def _cdiv(a, b):
    return -(-a // b)


def _group0_mask(t_i8):
    # Integer compare; widen i8 -> i32 so the i1 mask is produced directly in
    # the (8, 128) layout the f32 select consumes (no float cast, no relayout).
    return t_i8.astype(jnp.int32) == 0


def _fused_kernel(s_ref, t_ref, o_ref):
    # Whole (padded) problem resident in VMEM: one pass, one exp per element.
    e = jnp.exp(s_ref[...])
    is_g0 = _group0_mask(t_ref[...])
    sum0 = jnp.sum(jnp.where(is_g0, e, 0.0))
    sum_total = jnp.sum(e)
    inv0 = 1.0 / sum0
    inv1 = 1.0 / (sum_total - sum0)
    o_ref[...] = e * jnp.where(is_g0, inv0, inv1)


def _reduce_kernel(s_ref, t_ref, p_ref):
    # Per-tile partials: p[tile, 0, :] = sum_exp_group0, p[tile, 1, :] = sum_exp.
    e = jnp.exp(s_ref[...])
    is_g0 = _group0_mask(t_ref[...])
    sum0 = jnp.sum(jnp.where(is_g0, e, 0.0))
    sum_total = jnp.sum(e)
    p_ref[0, 0:1, :] = jnp.full((1, 128), sum0, jnp.float32)
    p_ref[0, 1:2, :] = jnp.full((1, 128), sum_total, jnp.float32)


def _scale_kernel(inv_ref, s_ref, t_ref, o_ref):
    # inv_ref: SMEM (2,) f32 = [1/sum0, 1/sum1] (reciprocals hoisted to wrapper).
    e = jnp.exp(s_ref[...])
    is_g0 = _group0_mask(t_ref[...])
    o_ref[...] = e * jnp.where(is_g0, inv_ref[0], inv_ref[1])


def scoring(s, T, *, cols=2048, tile_rows=512,
            fast_path_max_bytes=18 * 1024 * 1024):
    """s: (N,) float, T: (N,) int with values in {0, 1} -> (N,) float32."""
    assert cols % 128 == 0
    # int8 T tiles must respect the (32, 128) minimum tile for i8.
    assert tile_rows % 32 == 0 and tile_rows >= 32
    N = s.shape[0]

    s32 = s.astype(jnp.float32)
    t8 = T.astype(jnp.int8)

    rows = max(8, _cdiv(N, cols))

    # ---------------- fast path: VMEM-resident single pass ----------------
    rows8 = _cdiv(rows, 8) * 8
    if rows8 * cols * 9 <= fast_path_max_bytes:       # 4B s + 1B T + 4B out
        rows = rows8
        pad = rows * cols - N
        s_pad = jnp.pad(s32, (0, pad),
                        constant_values=_NEG_LARGE).reshape(rows, cols)
        t_pad = jnp.pad(t8, (0, pad)).reshape(rows, cols)
        out = pl.pallas_call(
            _fused_kernel,
            out_shape=jax.ShapeDtypeStruct((rows, cols), jnp.float32),
            grid=(1,),
            in_specs=[pl.BlockSpec((rows, cols), lambda i: (0, 0)),
                      pl.BlockSpec((rows, cols), lambda i: (0, 0))],
            out_specs=pl.BlockSpec((rows, cols), lambda i: (0, 0)),
            compiler_params=pltpu.CompilerParams(
                dimension_semantics=("arbitrary",),
                vmem_limit_bytes=_VMEM_LIMIT),
        )(s_pad, t_pad)
        return out.reshape(-1)[:N]

    # ---------------- streaming path: two parallel-grid kernels ----------------
    tr = min(tile_rows, _cdiv(rows, 32) * 32)   # avoid gross over-padding
    rows = _cdiv(rows, tr) * tr
    num_tiles = rows // tr
    pad = rows * cols - N

    s_pad = jnp.pad(s32, (0, pad),
                    constant_values=_NEG_LARGE).reshape(rows, cols)
    t_pad = jnp.pad(t8, (0, pad)).reshape(rows, cols)

    stream_params = pltpu.CompilerParams(
        dimension_semantics=("parallel",), vmem_limit_bytes=_VMEM_LIMIT)

    # Pass 1: per-tile partial sums (independent tiles -> both TCs on v7x).
    partials = pl.pallas_call(
        _reduce_kernel,
        out_shape=jax.ShapeDtypeStruct((num_tiles, 2, 128), jnp.float32),
        grid=(num_tiles,),
        in_specs=[pl.BlockSpec((tr, cols), lambda j: (j, 0)),
                  pl.BlockSpec((tr, cols), lambda j: (j, 0))],
        out_specs=pl.BlockSpec((1, 2, 128), lambda j: (j, 0, 0)),
        compiler_params=stream_params,
    )(s_pad, t_pad)

    # Combine partials + hoisted reciprocals (tiny XLA ops).
    sums = partials[:, :, 0].sum(axis=0)              # [sum0, sum_total]
    sum0 = sums[0]
    sum1 = sums[1] - sums[0]
    inv = jnp.stack([1.0 / sum0, 1.0 / sum1]).astype(jnp.float32)

    # Pass 2: out = exp(s) * inv[T]  (independent tiles).
    out = pl.pallas_call(
        _scale_kernel,
        out_shape=jax.ShapeDtypeStruct((rows, cols), jnp.float32),
        grid=(num_tiles,),
        in_specs=[pl.BlockSpec(memory_space=pltpu.MemorySpace.SMEM),
                  pl.BlockSpec((tr, cols), lambda j: (j, 0)),
                  pl.BlockSpec((tr, cols), lambda j: (j, 0))],
        out_specs=pl.BlockSpec((tr, cols), lambda j: (j, 0)),
        compiler_params=stream_params,
    )(inv, s_pad, t_pad)

    return out.reshape(-1)[:N]


def _reference(s, T):
    e = jnp.exp(s.astype(jnp.float32))
    sums = jnp.zeros((2,), jnp.float32).at[T].add(e)
    return e / sums[T]


if __name__ == "__main__":
    key = jax.random.PRNGKey(0)
    k1, k2, k3, k4 = jax.random.split(key, 4)

    # Small problem -> VMEM-resident fast path (exercises padding).
    N1 = 200
    s1 = jax.random.normal(k1, (N1,), dtype=jnp.float32)
    T1 = jax.random.bernoulli(k2, 0.5, (N1,)).astype(jnp.int32)
    out1 = scoring(s1, T1)
    jax.block_until_ready(out1)
    ref1 = _reference(s1, T1)
    assert jnp.allclose(out1, ref1, rtol=1e-5, atol=1e-7), "fast-path mismatch"

    # Larger problem with the fast path disabled -> streaming two-kernel path.
    N2 = 20_000
    s2 = jax.random.normal(k3, (N2,), dtype=jnp.float32)
    T2 = jax.random.bernoulli(k4, 0.5, (N2,)).astype(jnp.int32)
    out2 = scoring(s2, T2, cols=128, tile_rows=32, fast_path_max_bytes=0)
    jax.block_until_ready(out2)
    ref2 = _reference(s2, T2)
    assert jnp.allclose(out2, ref2, rtol=1e-4, atol=1e-9), "streaming mismatch"

    print("KERNEL_OK")
</pallas_src>

<mosaic_0001>
module attributes {stable_mosaic.version = 11 : i64} {
  func.func @_fused_kernel(%arg0: i32, %arg1: memref<8x2048xf32, #tpu.memory_space<vmem>>, %arg2: memref<8x2048xi8, #tpu.memory_space<vmem>>, %arg3: memref<8x2048xf32, #tpu.memory_space<vmem>>) attributes {dimension_semantics = [#tpu.dimension_semantics<arbitrary>], iteration_bounds = array<i64: 1>, scalar_prefetch = 0 : i64, scratch_operands = 0 : i64, tpu.core_type = #tpu.core_type<tc>, window_params = [{pipeline_mode = #tpu.pipeline_mode<synchronous>, transform_indices = @transform_0, window_bounds = array<i64: 8, 2048>}, {pipeline_mode = #tpu.pipeline_mode<synchronous>, transform_indices = @transform_1, window_bounds = array<i64: 8, 2048>}, {pipeline_mode = #tpu.pipeline_mode<synchronous>, transform_indices = @transform_2, window_bounds = array<i64: 8, 2048>}]} {
    %c0 = arith.constant 0 : index
    %c0_0 = arith.constant 0 : index
    %0 = vector.load %arg1[%c0, %c0_0] : memref<8x2048xf32, #tpu.memory_space<vmem>>, vector<8x2048xf32>
    %1 = math.exp %0 : vector<8x2048xf32>
    %c0_1 = arith.constant 0 : index
    %c0_2 = arith.constant 0 : index
    %2 = vector.load %arg2[%c0_1, %c0_2] : memref<8x2048xi8, #tpu.memory_space<vmem>>, vector<8x2048xi8>
    %3 = arith.extsi %2 : vector<8x2048xi8> to vector<8x2048xi32>
    %c0_i32 = arith.constant 0 : i32
    %4 = vector.broadcast %c0_i32 : i32 to vector<8x2048xi32>
    %5 = arith.cmpi eq, %3, %4 : vector<8x2048xi32>
    %cst = arith.constant 0.000000e+00 : f32
    %6 = vector.broadcast %cst : f32 to vector<8x2048xf32>
    %7 = arith.select %5, %1, %6 : vector<8x2048xi1>, vector<8x2048xf32>
    %8 = vector.shape_cast %7 : vector<8x2048xf32> to vector<1x8x2048xf32>
    %cst_3 = arith.constant dense<0.000000e+00> : vector<1xf32>
    %9 = vector.multi_reduction <add>, %8, %cst_3 [1, 2] : vector<1x8x2048xf32> to vector<1xf32>
    %10 = vector.shape_cast %9 : vector<1xf32> to vector<1x1x1xf32>
    %11 = vector.extract %10[0, 0, 0] : f32 from vector<1x1x1xf32>
    %12 = vector.shape_cast %1 : vector<8x2048xf32> to vector<1x8x2048xf32>
    %cst_4 = arith.constant dense<0.000000e+00> : vector<1xf32>
    %13 = vector.multi_reduction <add>, %12, %cst_4 [1, 2] : vector<1x8x2048xf32> to vector<1xf32>
    %14 = vector.shape_cast %13 : vector<1xf32> to vector<1x1x1xf32>
    %15 = vector.extract %14[0, 0, 0] : f32 from vector<1x1x1xf32>
    %cst_5 = arith.constant 1.000000e+00 : f32
    %16 = arith.divf %cst_5, %11 : f32
    %17 = arith.subf %15, %11 : f32
    %cst_6 = arith.constant 1.000000e+00 : f32
    %18 = arith.divf %cst_6, %17 : f32
    %19 = vector.broadcast %16 : f32 to vector<8x2048xf32>
    %20 = vector.broadcast %18 : f32 to vector<8x2048xf32>
    %21 = arith.select %5, %19, %20 : vector<8x2048xi1>, vector<8x2048xf32>
    %22 = arith.mulf %1, %21 : vector<8x2048xf32>
    %c0_7 = arith.constant 0 : index
    %c0_8 = arith.constant 0 : index
    %23 = vector.load %arg3[%c0_7, %c0_8] : memref<8x2048xf32, #tpu.memory_space<vmem>>, vector<8x2048xf32>
    tpu.vector_store %arg3[%c0_7, %c0_8], %22 {strides = array<i32>} : memref<8x2048xf32, #tpu.memory_space<vmem>>, vector<8x2048xf32>,
    return
  }
  func.func @transform_0(%arg0: i32) -> (i32, i32) {
    %c0_i32 = arith.constant 0 : i32
    %c0_i32_0 = arith.constant 0 : i32
    %c0_i32_1 = arith.constant 0 : i32
    return %c0_i32, %c0_i32_0 : i32, i32
  }
  func.func @transform_1(%arg0: i32) -> (i32, i32) {
    %c0_i32 = arith.constant 0 : i32
    %c0_i32_0 = arith.constant 0 : i32
    %c0_i32_1 = arith.constant 0 : i32
    return %c0_i32, %c0_i32_0 : i32, i32
  }
  func.func @transform_2(%arg0: i32) -> (i32, i32) {
    %c0_i32 = arith.constant 0 : i32
    %c0_i32_0 = arith.constant 0 : i32
    %c0_i32_1 = arith.constant 0 : i32
    return %c0_i32, %c0_i32_0 : i32, i32
  }
}

</mosaic_0001>

<bundles_post_ra>
// kernel: tpu_custom_call.1
= control target key start
LH: loop header
LB: loop body
LE: loop exit
PB: predicated region body
PF: predicated region fallthrough
CT: control target
= control target key end

     0   :  { %7 = vsyncpa [#allocation3], 0  ;;  %s605_s0 = inlined_call_operand.hbm [shape: f32[8,2048], index: 0, kind: input, shape index: {}]   ;;  %s606_s1 = inlined_call_operand.hbm [shape: s8[8,2048], index: 1, kind: input, shape index: {}]   ;;  %s607_s2 = inlined_call_operand.hbm [shape: f32[8,2048], index: 2, kind: output, shape index: {}]  }
   0x1   :  { %8 = vsyncpa [#allocation6], 0 }
   0x2   :  { %9 = vsyncpa [#allocation4], 0  ;;  %s370_s9 = smov [#allocation2]   ;;  %s371_s11 = smov [#allocation5]  }
   0x3   :  { %s16_s10 = sshll.u32 %s370_s9, 4  ;;  %s26_s12 = sshll.u32 %s371_s11, 4  ;;  %s17_s10 = int_to_ptr.vmem [resolvable:$true] %s16_s10  ;;  %s27_s12 = int_to_ptr.vmem [resolvable:$true] %s26_s12 }
   0x4   :  { %s312_s13 = scalar_lea.vmem %s17_s10, 2048  ;;  %p317_p1 = scmp.lt.s32.totalorder %s17_s10, %s17_s10 }
   0x5   :  { %p313_p0 = scmp.ne.s32.totalorder %s17_s10, %s312_s13  ;;  %p318_p2 = scmp.lt.s32.totalorder %s312_s13, %s312_s13 }
   0x7   :  { %p319_p3 = por %p318_p2, %p317_p1 }
   0x9   :  { %p320_p4 = pnand %p319_p3, %p313_p0 }
   0xb   :  { %323 = shalt.err (!%p320_p4)
}
   0xc   :  { %19 = dma.hbm_to_vmem [thread:$0]  %s605_s0, 2048, %s17_s10, [#allocation3]  }
   0xd   :  { %s332_s16 = scalar_lea.vmem %s27_s12, 512  ;;  %p337_p6 = scmp.lt.s32.totalorder %s27_s12, %s27_s12 }
   0xe   :  { %p333_p5 = scmp.ne.s32.totalorder %s27_s12, %s332_s16  ;;  %p338_p7 = scmp.lt.s32.totalorder %s332_s16, %s332_s16 }
  0x10   :  { %p339_p8 = por %p338_p7, %p337_p6 }
  0x12   :  { %p340_p9 = pnand %p339_p8, %p333_p5 }
  0x14   :  { %343 = shalt.err (!%p340_p9)
}
  0x15   :  { %29 = dma.hbm_to_vmem [thread:$0]  %s606_s1, 512, %s27_s12, [#allocation6]  }
  0x16   :  { %364 = dma.done.wait [#allocation3], 2048  }
  0x17   :  { %365 = vsyncadd [#allocation3], 4294965248 }
  0x18   :  { %366 = dma.done.wait [#allocation6], 512  }
  0x19   :  { %367 = vsyncadd [#allocation6], 4294966784  ;;  %v36_v0 = vld [vmem:[#allocation2] sm:$0xff]  ;;  %v37_v1 = vld [vmem:[#allocation2 + $0x8] sm:$0xff]  ;;  %s372_s22 = smov [#allocation7]  }
  0x1a   :  { %v38_v2 = vld [vmem:[#allocation2 + $0x10] sm:$0xff]  ;;  %v39_v3 = vld [vmem:[#allocation2 + $0x18] sm:$0xff]  ;;  %v52_v4 = vmul.f32 1.442695, %v36_v0  ;;  %v40_v5 = vld [vmem:[#allocation2 + $0x20] sm:$0xff]  ;;  %s247_s23 = sshll.u32 %s372_s22, 4  ;;  %s248_s23 = int_to_ptr.vmem [resolvable:$true] %s247_s23 }
  0x1b   :  { %v54_v6 = vmul.f32 1.442695, %v37_v1  ;;  %v41_v7 = vld [vmem:[#allocation2 + $0x28] sm:$0xff]  ;;  %v56_v8 = vmul.f32 1.442695, %v38_v2  ;;  %v42_v10 = vld [vmem:[#allocation2 + $0x30] sm:$0xff]  ;;  %p349_p11 = scmp.lt.s32.totalorder %s248_s23, %s248_s23 }
  0x1c   :  { %268 = vpow2.f32 %v52_v4  ;;  %v58_v9 = vmul.f32 1.442695, %v39_v3  ;;  %v60_v11 = vmul.f32 1.442695, %v40_v5  ;;  %v62_v12 = vmul.f32 1.442695, %v41_v7 }
  0x1d   :  { %270 = vpow2.f32 %v54_v6  ;;  %v43_v13 = vld [vmem:[#allocation2 + $0x38] sm:$0xff]  ;;  %v64_v14 = vmul.f32 1.442695, %v42_v10  ;;  %v44_v15 = vld [vmem:[#allocation2 + $0x40] sm:$0xff]  ;;  %v45_v18 = vld [vmem:[#allocation2 + $0x48] sm:$0xff]  ;;  %s344_s24 = scalar_lea.vmem %s248_s23, 2048 }
  0x1e   :  { %272 = vpow2.f32 %v56_v8  ;;  %v84_v16 = vld [vmem:[#allocation5] sm:$0xff]  ;;  %v66_v17 = vmul.f32 1.442695, %v43_v13  ;;  %v68_v19 = vmul.f32 1.442695, %v44_v15  ;;  %v46_v21 = vld [vmem:[#allocation2 + $0x50] sm:$0xff]  ;;  %p345_p10 = scmp.ne.s32.totalorder %s248_s23, %s344_s24  ;;  %p350_p12 = scmp.lt.s32.totalorder %s344_s24, %s344_s24 }
  0x1f   :  { %274 = vpow2.f32 %v58_v9  ;;  %v88_v20 = vunpack.c.0.s8 %v84_v16  ;;  %v89_v22 = vunpack.c.1.s8 %v84_v16  ;;  %v90_v23 = vunpack.c.2.s8 %v84_v16  ;;  %v85_v25 = vld [vmem:[#allocation5 + $0x8] sm:$0xff]  ;;  %v47_v26 = vld [vmem:[#allocation2 + $0x58] sm:$0xff]  ;;  %v48_v29 = vld [vmem:[#allocation2 + $0x60] sm:$0xff] }
  0x20   :  { %276 = vpow2.f32 %v60_v11  ;;  %v70_v24 = vmul.f32 1.442695, %v45_v18  ;;  %v91_v27 = vunpack.c.3.s8 %v84_v16  ;;  %v72_v30 = vmul.f32 1.442695, %v46_v21  ;;  %v49_v39 = vld [vmem:[#allocation2 + $0x68] sm:$0xff]  ;;  %v50_v48 = vld [vmem:[#allocation2 + $0x70] sm:$0xff]  ;;  %p351_p13 = por %p350_p12, %p349_p11 }
  0x21   :  { %278 = vpow2.f32 %v62_v12  ;;  %vm396_vm0 = vcmp.eq.s32.totalorder %v88_v20, 0  ;;  %v92_v33 = vunpack.c.0.s8 %v85_v25  ;;  %vm402_vm1 = vcmp.eq.s32.totalorder %v89_v22, 0  ;;  %v86_v53 = vld [vmem:[#allocation5 + $0x10] sm:$0xff]  ;;  %v51_v57 = vld [vmem:[#allocation2 + $0x78] sm:$0xff] }
  0x22   :  { %280 = vpow2.f32 %v64_v14  ;;  %vm406_vm2 = vcmp.eq.s32.totalorder %v90_v23, 0  ;;  %v74_v37 = vmul.f32 1.442695, %v47_v26  ;;  %v76_v40 = vmul.f32 1.442695, %v48_v29  ;;  %p352_p0 = pnand %p351_p13, %p345_p10 }
  0x23   :  { %282 = vpow2.f32 %v66_v17  ;;  %v93_v41 = vunpack.c.1.s8 %v85_v25  ;;  %vm414_vm3 = vcmp.eq.s32.totalorder %v91_v27, 0  ;;  %v94_v49 = vunpack.c.2.s8 %v85_v25  ;;  %v87_v17 = vld [vmem:[#allocation5 + $0x18] sm:$0xff] }
  0x24   :  { %284 = vpow2.f32 %v68_v19  ;;  %vm431_vm4 = vcmp.eq.s32.totalorder %v92_v33, 0  ;;  %v78_v52 = vmul.f32 1.442695, %v49_v39  ;;  %v95_v58 = vunpack.c.3.s8 %v85_v25 }
  0x25   :  { %286 = vpow2.f32 %v70_v24  ;;  %vm441_vm5 = vcmp.eq.s32.totalorder %v93_v41, 0  ;;  %v80_v61 = vmul.f32 1.442695, %v50_v48  ;;  %v96_v1 = vunpack.c.0.s8 %v86_v53 }
  0x26   :  { %288 = vpow2.f32 %v72_v30  ;;  %vm451_vm6 = vcmp.eq.s32.totalorder %v94_v49, 0  ;;  %v82_v4 = vmul.f32 1.442695, %v51_v57  ;;  %v97_v8 = vunpack.c.1.s8 %v86_v53 }
  0x27   :  { %290 = vpow2.f32 %v74_v37  ;;  %vm461_vm7 = vcmp.eq.s32.totalorder %v95_v58, 0  ;;  %v98_v14 = vunpack.c.2.s8 %v86_v53  ;;  %vm471_vm8 = vcmp.eq.s32.totalorder %v96_v1, 0 }
  0x28   :  { %292 = vpow2.f32 %v76_v40  ;;  %v99_v21 = vunpack.c.3.s8 %v86_v53  ;;  %vm481_vm9 = vcmp.eq.s32.totalorder %v97_v8, 0  ;;  %v100_v27 = vunpack.c.0.s8 %v87_v17 }
  0x29   :  { %v394_v28 = vpop.eup %268  ;;  %294 = vpow2.f32 %v78_v52  ;;  %vm491_vm10 = vcmp.eq.s32.totalorder %v98_v14, 0  ;;  %v101_v40 = vunpack.c.1.s8 %v87_v17  ;;  %v102_v48 = vunpack.c.2.s8 %v87_v17 }
  0x2a   :  { %v400_v32 = vpop.eup %270  ;;  %v120_v43 = vsel %vm396_vm0, %v394_v28, 0.0  ;;  %296 = vpow2.f32 %v80_v61  ;;  %vm501_vm11 = vcmp.eq.s32.totalorder %v99_v21, 0  ;;  %vm511_vm12 = vcmp.eq.s32.totalorder %v100_v27, 0 }
  0x2b   :  { %v410_v36 = vpop.eup %272  ;;  %v121_v44 = vsel %vm402_vm1, %v400_v32, 0.0  ;;  %v160_v46 = vadd.f32 %v400_v32, %v394_v28  ;;  %298 = vpow2.f32 %v82_v4  ;;  %vm521_vm13 = vcmp.eq.s32.totalorder %v101_v40, 0 }
  0x2c   :  { %v412_v38 = vpop.eup %274  ;;  %v122_v45 = vsel %vm406_vm2, %v410_v36, 0.0  ;;  %v136_v51 = vadd.f32 %v121_v44, %v120_v43  ;;  %vm531_vm14 = vcmp.eq.s32.totalorder %v102_v48, 0 }
  0x2d   :  { %v429_v47 = vpop.eup %276  ;;  %v123_v54 = vsel %vm414_vm3, %v412_v38, 0.0  ;;  %v161_v55 = vadd.f32 %v410_v36, %v160_v46 }
  0x2e   :  { %v439_v56 = vpop.eup %278  ;;  %v137_v60 = vadd.f32 %v136_v51, %v122_v45  ;;  %v124_v62 = vsel %vm431_vm4, %v429_v47, 0.0 }
  0x2f   :  { %v162_v63 = vadd.f32 %v412_v38, %v161_v55  ;;  %v449_v0 = vpop.eup %280  ;;  %v125_v5 = vsel %vm441_vm5, %v439_v56, 0.0  ;;  %v103_v55 = vunpack.c.3.s8 %v87_v17 }
  0x30   :  { %v138_v3 = vadd.f32 %v137_v60, %v123_v54  ;;  %v459_v7 = vpop.eup %282  ;;  %v126_v11 = vsel %vm451_vm6, %v449_v0, 0.0 }
  0x31   :  { %v163_v6 = vadd.f32 %v429_v47, %v162_v63  ;;  %v469_v13 = vpop.eup %284  ;;  %v127_v18 = vsel %vm461_vm7, %v459_v7, 0.0  ;;  %vm541_vm15 = vcmp.eq.s32.totalorder %v103_v55, 0 }
  0x32   :  { %v139_v10 = vadd.f32 %v138_v3, %v124_v62  ;;  %v479_v20 = vpop.eup %286  ;;  %v128_v24 = vsel %vm471_vm8, %v469_v13, 0.0 }
  0x33   :  { %v164_v12 = vadd.f32 %v439_v56, %v163_v6  ;;  %v489_v26 = vpop.eup %288  ;;  %v129_v33 = vsel %vm481_vm9, %v479_v20, 0.0 }
  0x34   :  { %v140_v16 = vadd.f32 %v139_v10, %v125_v5  ;;  %v499_v39 = vpop.eup %290  ;;  %v130_v44 = vsel %vm491_vm10, %v489_v26, 0.0 }
  0x35   :  { %v165_v19 = vadd.f32 %v449_v0, %v164_v12  ;;  %v509_v46 = vpop.eup %292  ;;  %v131_v52 = vsel %vm501_vm11, %v499_v39, 0.0 }
  0x36   :  { %v141_v23 = vadd.f32 %v140_v16, %v126_v11  ;;  %v519_v54 = vpop.eup %294  ;;  %v132_v60 = vsel %vm511_vm12, %v509_v46, 0.0 }
  0x37   :  { %v166_v25 = vadd.f32 %v459_v7, %v165_v19  ;;  %v529_v62 = vpop.eup %296  ;;  %v133_v3 = vsel %vm521_vm13, %v519_v54, 0.0 }
  0x38   :  { %v142_v30 = vadd.f32 %v141_v23, %v127_v18  ;;  %v539_v5 = vpop.eup %298  ;;  %v134_v10 = vsel %vm531_vm14, %v529_v62, 0.0 }
  0x39   :  { %v167_v37 = vadd.f32 %v469_v13, %v166_v25  ;;  %v135_v14 = vsel %vm541_vm15, %v539_v5, 0.0 }
  0x3a   :  { %v143_v43 = vadd.f32 %v142_v30, %v128_v24 }
  0x3b   :  { %v168_v45 = vadd.f32 %v479_v20, %v167_v37 }
  0x3c   :  { %v144_v51 = vadd.f32 %v143_v43, %v129_v33 }
  0x3d   :  { %v169_v53 = vadd.f32 %v489_v26, %v168_v45 }
  0x3e   :  { %v145_v58 = vadd.f32 %v144_v51, %v130_v44 }
  0x3f   :  { %v170_v61 = vadd.f32 %v499_v39, %v169_v53 }
  0x40   :  { %v146_v1 = vadd.f32 %v145_v58, %v131_v52 }
  0x41   :  { %v171_v4 = vadd.f32 %v509_v46, %v170_v61 }
  0x42   :  { %v147_v8 = vadd.f32 %v146_v1, %v132_v60 }
  0x43   :  { %v172_v11 = vadd.f32 %v519_v54, %v171_v4 }
  0x44   :  { %v148_v12 = vadd.f32 %v147_v8, %v133_v3 }
  0x45   :  { %v173_v17 = vadd.f32 %v529_v62, %v172_v11 }
  0x46   :  { %v149_v16 = vadd.f32 %v148_v12, %v134_v10 }
  0x47   :  { %v174_v19 = vadd.f32 %v539_v5, %v173_v17 }
  0x48   :  { %v150_v18 = vadd.f32 %v149_v16, %v135_v14 }
  0x4a   :  { %151 = vadd.xlane.f32.xlu0 %v150_v18 }
  0x4e   :  { %175 = vadd.xlane.f32.xlu0 %v174_v19 }
  0xd3   :  { %v152_v21 = vpop.xlane.xlu0 %151 }
  0xd4   :  { %v153_v23 = vrot.slane %v152_v21, 4 }
  0xd6   :  { %v154_v24 = vadd.f32 %v153_v23, %v152_v21 }
  0xd7   :  { %v176_v25 = vpop.xlane.xlu0 %175 }
  0xd8   :  { %v155_v27 = vrot.slane %v154_v24, 2  ;;  %v177_v30 = vrot.slane %v176_v25, 4 }
  0xda   :  { %v178_v33 = vadd.f32 %v177_v30, %v176_v25  ;;  %v156_v37 = vadd.f32 %v155_v27, %v154_v24 }
  0xdc   :  { %v179_v40 = vrot.slane %v178_v33, 2  ;;  %v157_v43 = vrot.slane %v156_v37, 1 }
  0xde   :  { %v180_v44 = vadd.f32 %v179_v40, %v178_v33  ;;  %v158_v45 = vadd.f32 %v157_v43, %v156_v37 }
  0xe0   :  { %257 = vpush %v158_v45  ;;  %v181_v48 = vrot.slane %v180_v44, 1 }
  0xe2   :  { %v182_v51 = vadd.f32 %v181_v48, %v180_v44 }
  0xe4   :  { %259 = vpush %v182_v51 }
 0x111   :  { %s258_s0 = spop %257 }
 0x112   :  { %v184_v52 = vstv %s258_s0 }
 0x113   :  { %300 = vrcp.f32 %v184_v52 }
 0x115   :  { %s260_s1 = spop %259 }
 0x116   :  { %s187_s19 = ssub.f32 %s260_s1, %s258_s0 }
 0x118   :  { %v188_v53 = vstv %s187_s19 }
 0x119   :  { %302 = vrcp.f32 %v188_v53 }
 0x120   :  { %v301_v55 = vpop.eup %300 }
 0x121   :  { %261 = vpush %v301_v55 }
 0x126   :  { %v303_v58 = vpop.eup %302 }
 0x127   :  { %263 = vpush %v303_v58 }
 0x152   :  { %s262_s20 = spop %261 }
 0x153   :  { %v191_v60 = vstv %s262_s20 }
 0x158   :  { %s264_s21 = spop %263 }
 0x159   :  { %v192_v61 = vstv %s264_s21 }
 0x15a   :  { %v193_v1 = vsel %vm396_vm0, %v191_v60, %v192_v61  ;;  %v194_v3 = vsel %vm402_vm1, %v191_v60, %v192_v61  ;;  %v195_v4 = vsel %vm406_vm2, %v191_v60, %v192_v61  ;;  %v196_v8 = vsel %vm414_vm3, %v191_v60, %v192_v61 }
 0x15b   :  { %v197_v10 = vsel %vm431_vm4, %v191_v60, %v192_v61  ;;  %v198_v11 = vsel %vm441_vm5, %v191_v60, %v192_v61  ;;  %v199_v12 = vsel %vm451_vm6, %v191_v60, %v192_v61  ;;  %v200_v31 = vsel %vm461_vm7, %v191_v60, %v192_v61 }
 0x15c   :  { %v201_v34 = vsel %vm471_vm8, %v191_v60, %v192_v61  ;;  %v202_v35 = vsel %vm481_vm9, %v191_v60, %v192_v61  ;;  %v203_v42 = vsel %vm491_vm10, %v191_v60, %v192_v61  ;;  %v204_v50 = vsel %vm501_vm11, %v191_v60, %v192_v61 }
 0x15d   :  { %v205_v59 = vsel %vm511_vm12, %v191_v60, %v192_v61  ;;  %v206_v2 = vsel %vm521_vm13, %v191_v60, %v192_v61  ;;  %v207_v9 = vsel %vm531_vm14, %v191_v60, %v192_v61  ;;  %v208_v15 = vsel %vm541_vm15, %v191_v60, %v192_v61 }
 0x15e   :  { %v209_v22 = vmul.f32 %v394_v28, %v193_v1  ;;  %v210_v29 = vmul.f32 %v400_v32, %v194_v3  ;;  %v211_v14 = vmul.f32 %v410_v36, %v195_v4  ;;  %v212_v41 = vmul.f32 %v412_v38, %v196_v8 }
 0x15f   :  { %v213_v49 = vmul.f32 %v429_v47, %v197_v10  ;;  %v214_v57 = vmul.f32 %v439_v56, %v198_v11  ;;  %v215_v63 = vmul.f32 %v449_v0, %v199_v12  ;;  %v216_v16 = vmul.f32 %v459_v7, %v200_v31 }
 0x160   :  { %v217_v6 = vmul.f32 %v469_v13, %v201_v34  ;;  %v218_v28 = vmul.f32 %v479_v20, %v202_v35  ;;  %v219_v32 = vmul.f32 %v489_v26, %v203_v42  ;;  %v220_v36 = vmul.f32 %v499_v39, %v204_v50  ;;  %225 = vst [vmem:[#allocation7] sm:$0xff] %v209_v22 }
 0x161   :  { %226 = vst [vmem:[#allocation7 + $0x8] sm:$0xff] %v210_v29  ;;  %227 = vst [vmem:[#allocation7 + $0x10] sm:$0xff] %v211_v14  ;;  %v221_v38 = vmul.f32 %v509_v46, %v205_v59  ;;  %v222_v47 = vmul.f32 %v519_v54, %v206_v2  ;;  %v223_v56 = vmul.f32 %v529_v62, %v207_v9 }
 0x162   :  { %228 = vst [vmem:[#allocation7 + $0x18] sm:$0xff] %v212_v41  ;;  %v224_v0 = vmul.f32 %v539_v5, %v208_v15  ;;  %229 = vst [vmem:[#allocation7 + $0x20] sm:$0xff] %v213_v49 }
 0x163   :  { %230 = vst [vmem:[#allocation7 + $0x28] sm:$0xff] %v214_v57  ;;  %231 = vst [vmem:[#allocation7 + $0x30] sm:$0xff] %v215_v63 }
 0x164   :  { %232 = vst [vmem:[#allocation7 + $0x38] sm:$0xff] %v216_v16  ;;  %233 = vst [vmem:[#allocation7 + $0x40] sm:$0xff] %v217_v6 }
 0x165   :  { %234 = vst [vmem:[#allocation7 + $0x48] sm:$0xff] %v218_v28  ;;  %235 = vst [vmem:[#allocation7 + $0x50] sm:$0xff] %v219_v32 }
 0x166   :  { %236 = vst [vmem:[#allocation7 + $0x58] sm:$0xff] %v220_v36  ;;  %237 = vst [vmem:[#allocation7 + $0x60] sm:$0xff] %v221_v38 }
 0x167   :  { %238 = vst [vmem:[#allocation7 + $0x68] sm:$0xff] %v222_v47  ;;  %239 = vst [vmem:[#allocation7 + $0x70] sm:$0xff] %v223_v56 }
 0x168   :  { %240 = vst [vmem:[#allocation7 + $0x78] sm:$0xff] %v224_v0 }
 0x169   :  { %355 = shalt.err (!%p352_p0)
}
 0x16a   :  { %250 = dma.vmem_to_hbm [thread:$0]  %s248_s23, 2048, %s607_s2, [#allocation4]  }
 0x16b   :  { %368 = dma.done.wait [#allocation4], 2048  }
 0x16c   :  { %369 = vsyncadd [#allocation4], 4294965248 }
 0x16d   :  { %254 = vsyncpa [#allocation3], 1 }
 0x16e   :  { %255 = vsyncpa [#allocation6], 1 }
 0x16f   :  { %256 = vsyncpa [#allocation4], 1 }

</bundles_post_ra>
